<compile_context>
chip_gen: v7x
topology: tpu7x:2x2x1
jax: 0.10.0
libtpu: 0.0.40
codegen_flags: <defaults>
</compile_context>

<pallas_src>
import functools

import jax
import jax.numpy as jnp
from jax.experimental import pallas as pl
from jax.experimental.pallas import tpu as pltpu


def _round_up(n, m):
    return ((n + m - 1) // m) * m


def _mxu_pad_granularity():
    """128-deep MXU passes for v5e and older (128x128 MXUs), 256 for v6e/v7x."""
    try:
        kind = jax.devices()[0].device_kind.lower()
        if any(t in kind for t in ("v2", "v3", "v4", "v5")):
            return 128
        return 256
    except Exception:
        return 128


def _vmem_capacity_bytes():
    try:
        return int(pltpu.get_tpu_info().vmem_capacity_bytes)
    except Exception:
        return 64 * 1024 * 1024  # conservative (v7x per-TensorCore)


def _resident_spec(shape):
    """Weight/bias spec: constant index_map (VMEM-resident across grid steps),
    single-buffered when the installed Pallas supports pipeline_mode."""
    idx = lambda i: (0, 0)
    try:
        return pl.BlockSpec(shape, idx, pipeline_mode=pl.Buffered(1))
    except (TypeError, AttributeError):
        return pl.BlockSpec(shape, idx)


def _fcn_kernel(x_ref, w1_ref, b1_ref, w2_ref, b2_ref, o_ref, *, activation):
    # x: (TB, K) input dtype ; w1: (K, Hp) mm dtype ; b1: (1, Hp) f32
    # w2: (Hp, Op) mm dtype  ; b2: (1, Op) f32      ; o: (TB, Op) f32
    x = x_ref[...].astype(w1_ref.dtype)  # operand cast in-kernel (no extra HBM pass)
    h = jnp.dot(x, w1_ref[...], preferred_element_type=jnp.float32)
    h = h + b1_ref[...]                  # bias in f32 on the VPU
    if activation == "relu":
        h = jnp.maximum(h, 0.0)
    elif activation == "sigmoid":
        h = jax.nn.sigmoid(h)
    elif activation == "tanh":
        h = jnp.tanh(h)
    else:
        raise ValueError(f"unsupported activation: {activation}")
    # TODO(synk): dropout is identity at inference (PyTorch eval mode); training-mode
    # dropout would need pltpu.prng_seed / prng_random_bits masking here.
    h = h.astype(w2_ref.dtype)           # back to MXU operand dtype for fc2
    o = jnp.dot(h, w2_ref[...], preferred_element_type=jnp.float32) + b2_ref[...]
    o_ref[...] = o.astype(o_ref.dtype)


def prepare_fcn_params(w1, b1, w2, b2, *, use_bf16=True, pad_to=None):
    """Pad / cast fc parameters ONCE (hoisted out of the per-call forward path).

    w1: (input_size, hidden), w2: (hidden, output_size) — transposed vs nn.Linear.
    Zero padding is numerically exact (padded w2 rows are zero, so the activation of
    padded h columns contributes nothing).
    """
    if pad_to is None:
        pad_to = _mxu_pad_granularity()
    input_size, hidden = w1.shape
    hidden2, output_size = w2.shape
    assert hidden2 == hidden
    Hp = _round_up(hidden, pad_to)      # lane dim of h / contraction dim of fc2
    Op = _round_up(output_size, 128)    # lane-dense output slab
    mm_dtype = jnp.bfloat16 if use_bf16 else jnp.float32
    w1_p = jnp.zeros((input_size, Hp), mm_dtype).at[:, :hidden].set(w1.astype(mm_dtype))
    b1_p = jnp.zeros((1, Hp), jnp.float32).at[0, :hidden].set(b1.astype(jnp.float32))
    w2_p = jnp.zeros((Hp, Op), mm_dtype).at[:hidden, :output_size].set(w2.astype(mm_dtype))
    b2_p = jnp.zeros((1, Op), jnp.float32).at[0, :output_size].set(b2.astype(jnp.float32))
    return w1_p, b1_p, w2_p, b2_p


def global_fcn_forward(x, params, *, output_size, horizon, n_links, n_target_features,
                       activation="relu", block_b=None):
    """x: (B, n_links, n_features, seq_len).  Returns (B, horizon, n_links*n_target_features)."""
    w1_p, b1_p, w2_p, b2_p = params
    B = x.shape[0]
    x2d = x.reshape(B, -1)               # flatten only; no pad, no cast
    K = x2d.shape[1]
    assert K == w1_p.shape[0], "flattened input size must match fc1 fan-in"
    Hp = w1_p.shape[1]
    Op = w2_p.shape[1]
    mm_itemsize = jnp.dtype(w1_p.dtype).itemsize
    x_itemsize = jnp.dtype(x2d.dtype).itemsize
    sub = 16 if w1_p.dtype == jnp.bfloat16 else 8   # sublane pack of the packed intermediates

    # --- batch tile: >=4 grid steps (v7x megacore), sublane-aligned, VMEM-bounded -----
    if block_b is None:
        cand = _round_up(max(1, pl.cdiv(B, 4)), sub)
        block_b = min(max(sub, min(256, cand)), B)
    else:
        block_b = int(block_b)
        if block_b <= 0:
            raise ValueError("block_b must be positive")
        if block_b >= B:
            block_b = B                       # single full-extent tile
        elif block_b % sub:
            block_b = min(_round_up(block_b, sub), B)

    budget = min(int(0.75 * _vmem_capacity_bytes()), 100 * 1024 * 1024)

    def footprint(tb):
        # double-buffered x / out tiles + single-buffered residents
        # + compiler-allocated in-kernel intermediates (x cast, h f32, h cast).
        return (2 * tb * K * x_itemsize
                + 2 * tb * Op * 4
                + (K * Hp + Hp * Op) * mm_itemsize
                + (Hp + Op) * 4
                + tb * (K * mm_itemsize + Hp * (4 + mm_itemsize)))

    while block_b > sub and footprint(block_b) > budget:
        block_b = max(sub, _round_up(block_b // 2, sub))

    grid = (pl.cdiv(B, block_b),)
    vmem_limit = int(min(budget,
                         max(32 * 1024 * 1024, int(footprint(block_b) * 1.3) + (2 << 20))))

    cost = pl.CostEstimate(
        flops=2 * B * (K * Hp + Hp * Op),
        transcendentals=0 if activation == "relu" else B * Hp,
        bytes_accessed=(B * K * x_itemsize
                        + (K * Hp + Hp * Op) * mm_itemsize
                        + (Hp + Op) * 4
                        + B * Op * 4),
    )

    out = pl.pallas_call(
        functools.partial(_fcn_kernel, activation=activation),
        out_shape=jax.ShapeDtypeStruct((B, Op), jnp.float32),
        grid_spec=pltpu.PrefetchScalarGridSpec(
            num_scalar_prefetch=0,
            grid=grid,
            in_specs=[
                pl.BlockSpec((block_b, K), lambda i: (i, 0)),  # x tile, pipelined over batch
                _resident_spec((K, Hp)),                       # W1 (resident, single-buffered)
                _resident_spec((1, Hp)),                       # b1
                _resident_spec((Hp, Op)),                      # W2
                _resident_spec((1, Op)),                       # b2
            ],
            out_specs=pl.BlockSpec((block_b, Op), lambda i: (i, 0)),
        ),
        compiler_params=pltpu.CompilerParams(
            dimension_semantics=("parallel",),
            vmem_limit_bytes=vmem_limit,
        ),
        cost_estimate=cost,
    )(x2d, w1_p, b1_p, w2_p, b2_p)

    # TODO(synk): when output_size << 128 a bf16 out slab (or masked narrow store) would
    # halve the HBM writeback; kept f32 for exact parity with the PyTorch module output.
    out = out[:, :output_size]
    return out.reshape(B, horizon, n_links * n_target_features)


def init_linear_params(key, fan_in, fan_out):
    """Deterministic init mimicking nn.Linear (uniform(-1/sqrt(fan_in), 1/sqrt(fan_in)))."""
    kw, kb = jax.random.split(key)
    bound = 1.0 / (fan_in ** 0.5)
    # stored as (fan_in, fan_out), i.e. transpose of PyTorch's (out, in) weight
    w = jax.random.uniform(kw, (fan_in, fan_out), jnp.float32, -bound, bound)
    b = jax.random.uniform(kb, (fan_out,), jnp.float32, -bound, bound)
    return w, b


if __name__ == "__main__":
    # Synthetic "predictor" configuration
    n_links = 4            # len(traffic_data.links)
    n_features = 2         # len(traffic_data.features)
    seq_len = 8            # predictor.seq_len
    n_target_features = 1  # len(predictor.target_feature)
    horizon = 3            # predictor.horizon (int)
    hidden_size = 32       # predictor.hidden_size
    batch = 2

    input_size = n_links * n_features * seq_len              # 64
    output_size = n_links * n_target_features * horizon      # 12

    key = jax.random.PRNGKey(0)
    kx, k1, k2 = jax.random.split(key, 3)

    x = jax.random.normal(kx, (batch, n_links, n_features, seq_len), jnp.float32)
    w1, b1 = init_linear_params(k1, input_size, hidden_size)
    w2, b2 = init_linear_params(k2, hidden_size, output_size)

    # Pad / cast the parameters once (hoisted out of the per-call path).
    params = prepare_fcn_params(w1, b1, w2, b2, use_bf16=True)

    fwd = jax.jit(functools.partial(
        global_fcn_forward,
        output_size=output_size, horizon=horizon, n_links=n_links,
        n_target_features=n_target_features, activation="relu"))

    y = fwd(x, params)
    y = jax.block_until_ready(y)
    assert y.shape == (batch, horizon, n_links * n_target_features)

    # Reference 1: plain-JAX with the same bf16 operand casts (tight tolerance).
    x2d = x.reshape(batch, -1)
    h_ref = jnp.maximum(
        jnp.dot(x2d.astype(jnp.bfloat16), w1.astype(jnp.bfloat16),
                preferred_element_type=jnp.float32) + b1, 0.0)
    ref_bf16 = (jnp.dot(h_ref.astype(jnp.bfloat16), w2.astype(jnp.bfloat16),
                        preferred_element_type=jnp.float32) + b2
                ).reshape(batch, horizon, n_links * n_target_features)
    assert jnp.allclose(y, ref_bf16, atol=2e-3, rtol=2e-3)

    # Reference 2: full-f32 math (loose tolerance; bounds bf16 rounding error).
    ref_f32 = (jnp.maximum(x2d @ w1 + b1, 0.0) @ w2 + b2).reshape(
        batch, horizon, n_links * n_target_features)
    assert jnp.allclose(y, ref_f32, atol=5e-2, rtol=5e-2)

    print("KERNEL_OK")
</pallas_src>

<mosaic_0001>
module attributes {stable_mosaic.version = 11 : i64} {
  func.func @_fcn_kernel(%arg0: i32, %arg1: memref<2x64xf32, #tpu.memory_space<vmem>>, %arg2: memref<64x256xbf16, #tpu.memory_space<vmem>>, %arg3: memref<1x256xf32, #tpu.memory_space<vmem>>, %arg4: memref<256x128xbf16, #tpu.memory_space<vmem>>, %arg5: memref<1x128xf32, #tpu.memory_space<vmem>>, %arg6: memref<2x128xf32, #tpu.memory_space<vmem>>) attributes {dimension_semantics = [#tpu.dimension_semantics<parallel>], iteration_bounds = array<i64: 1>, scalar_prefetch = 0 : i64, scratch_operands = 0 : i64, tpu.core_type = #tpu.core_type<tc>, window_params = [{transform_indices = @transform_0, window_bounds = array<i64: 2, 64>}, {pipeline_mode = #tpu.pipeline_mode<synchronous>, transform_indices = @transform_1, window_bounds = array<i64: 64, 256>}, {pipeline_mode = #tpu.pipeline_mode<synchronous>, transform_indices = @transform_2, window_bounds = array<i64: 1, 256>}, {pipeline_mode = #tpu.pipeline_mode<synchronous>, transform_indices = @transform_3, window_bounds = array<i64: 256, 128>}, {pipeline_mode = #tpu.pipeline_mode<synchronous>, transform_indices = @transform_4, window_bounds = array<i64: 1, 128>}, {transform_indices = @transform_5, window_bounds = array<i64: 2, 128>}]} {
    %c0 = arith.constant 0 : index
    %c0_0 = arith.constant 0 : index
    %0 = vector.load %arg1[%c0, %c0_0] : memref<2x64xf32, #tpu.memory_space<vmem>>, vector<2x64xf32>
    %1 = arith.truncf %0 : vector<2x64xf32> to vector<2x64xbf16>
    %c0_1 = arith.constant 0 : index
    %c0_2 = arith.constant 0 : index
    %2 = vector.load %arg2[%c0_1, %c0_2] : memref<64x256xbf16, #tpu.memory_space<vmem>>, vector<64x256xbf16>
    %cst = arith.constant dense<0.000000e+00> : vector<2x256xf32>
    %3 = tpu.matmul %1, %2, %cst {dimension_numbers = #tpu.dot_dimension_numbers<[1], [0], [0], [1], [0, 0, 1, 1], [], []>} : vector<2x64xbf16>, vector<64x256xbf16>, vector<2x256xf32> -> vector<2x256xf32>
    %c0_3 = arith.constant 0 : index
    %c0_4 = arith.constant 0 : index
    %4 = vector.load %arg3[%c0_3, %c0_4] : memref<1x256xf32, #tpu.memory_space<vmem>>, vector<1x256xf32>
    %5 = vector.broadcast %4 : vector<1x256xf32> to vector<2x256xf32>
    %6 = arith.addf %3, %5 : vector<2x256xf32>
    %cst_5 = arith.constant 0.000000e+00 : f32
    %7 = vector.broadcast %cst_5 : f32 to vector<2x256xf32>
    %8 = arith.maximumf %6, %7 : vector<2x256xf32>
    %9 = arith.truncf %8 : vector<2x256xf32> to vector<2x256xbf16>
    %c0_6 = arith.constant 0 : index
    %c0_7 = arith.constant 0 : index
    %10 = vector.load %arg4[%c0_6, %c0_7] : memref<256x128xbf16, #tpu.memory_space<vmem>>, vector<256x128xbf16>
    %cst_8 = arith.constant dense<0.000000e+00> : vector<2x128xf32>
    %11 = tpu.matmul %9, %10, %cst_8 {dimension_numbers = #tpu.dot_dimension_numbers<[1], [0], [0], [1], [0, 0, 1, 1], [], []>} : vector<2x256xbf16>, vector<256x128xbf16>, vector<2x128xf32> -> vector<2x128xf32>
    %c0_9 = arith.constant 0 : index
    %c0_10 = arith.constant 0 : index
    %12 = vector.load %arg5[%c0_9, %c0_10] : memref<1x128xf32, #tpu.memory_space<vmem>>, vector<1x128xf32>
    %13 = vector.broadcast %12 : vector<1x128xf32> to vector<2x128xf32>
    %14 = arith.addf %11, %13 : vector<2x128xf32>
    %c0_11 = arith.constant 0 : index
    %c0_12 = arith.constant 0 : index
    %15 = vector.load %arg6[%c0_11, %c0_12] : memref<2x128xf32, #tpu.memory_space<vmem>>, vector<2x128xf32>
    tpu.vector_store %arg6[%c0_11, %c0_12], %14 {strides = array<i32>} : memref<2x128xf32, #tpu.memory_space<vmem>>, vector<2x128xf32>,
    return
  }
  func.func @transform_0(%arg0: i32) -> (i32, i32) {
    %c0_i32 = arith.constant 0 : i32
    %c0_i32_0 = arith.constant 0 : i32
    return %arg0, %c0_i32 : i32, i32
  }
  func.func @transform_1(%arg0: i32) -> (i32, i32) {
    %c0_i32 = arith.constant 0 : i32
    %c0_i32_0 = arith.constant 0 : i32
    %c0_i32_1 = arith.constant 0 : i32
    return %c0_i32, %c0_i32_0 : i32, i32
  }
  func.func @transform_2(%arg0: i32) -> (i32, i32) {
    %c0_i32 = arith.constant 0 : i32
    %c0_i32_0 = arith.constant 0 : i32
    %c0_i32_1 = arith.constant 0 : i32
    return %c0_i32, %c0_i32_0 : i32, i32
  }
  func.func @transform_3(%arg0: i32) -> (i32, i32) {
    %c0_i32 = arith.constant 0 : i32
    %c0_i32_0 = arith.constant 0 : i32
    %c0_i32_1 = arith.constant 0 : i32
    return %c0_i32, %c0_i32_0 : i32, i32
  }
  func.func @transform_4(%arg0: i32) -> (i32, i32) {
    %c0_i32 = arith.constant 0 : i32
    %c0_i32_0 = arith.constant 0 : i32
    %c0_i32_1 = arith.constant 0 : i32
    return %c0_i32, %c0_i32_0 : i32, i32
  }
  func.func @transform_5(%arg0: i32) -> (i32, i32) {
    %c0_i32 = arith.constant 0 : i32
    %c0_i32_0 = arith.constant 0 : i32
    return %arg0, %c0_i32 : i32, i32
  }
}

</mosaic_0001>

<bundles_post_ra>
// kernel: global_fcn_forward.1
= control target key start
LH: loop header
LB: loop body
LE: loop exit
PB: predicated region body
PF: predicated region fallthrough
CT: control target
= control target key end

     0   :  { %10 = vsyncpa [#allocation3], 0  ;;  %s546_s0 = inlined_call_operand.vmem [shape: f32[2,64], index: 0, kind: input, shape index: {}]   ;;  %s547_s1 = inlined_call_operand.hbm [shape: bf16[64,256], index: 1, kind: input, shape index: {}]   ;;  %s548_s2 = inlined_call_operand.vmem [shape: f32[1,256], index: 2, kind: input, shape index: {}]   ;;  %s549_s3 = inlined_call_operand.hbm [shape: bf16[256,128], index: 3, kind: input, shape index: {}]   ;;  %s550_s4 = inlined_call_operand.vmem [shape: f32[1,128], index: 4, kind: input, shape index: {}]   ;;  %s551_s5 = inlined_call_operand.vmem [shape: f32[2,128], index: 5, kind: output, shape index: {}]  }
   0x1   :  { %11 = vsyncpa [#allocation5], 0  ;;  %s473_s18 = smov [#allocation2]   ;;  %s425_s22 = scalar_lea.hbm %s547_s1, 1024 }
   0x2   :  { %s19_s19 = sshll.u32 %s473_s18, 4  ;;  %p426_p0 = scmp.ne.s32.totalorder %s547_s1, %s425_s22  ;;  %s20_s19 = int_to_ptr.vmem [resolvable:$true] %s19_s19 }
   0x3   :  { %p429_p1 = scmp.lt.u32.totalorder %s425_s22, %s547_s1 }
   0x5   :  { %p431_p2 = pnand %p429_p1, %p426_p0 }
   0x7   :  { %434 = shalt.err (!%p431_p2)
}
   0x8   :  { %s435_s27 = scalar_lea.vmem %s20_s19, 1024  ;;  %p440_p4 = scmp.lt.s32.totalorder %s20_s19, %s20_s19 }
   0x9   :  { %p436_p3 = scmp.ne.s32.totalorder %s20_s19, %s435_s27  ;;  %p441_p5 = scmp.lt.s32.totalorder %s435_s27, %s435_s27 }
   0xb   :  { %p442_p6 = por %p441_p5, %p440_p4 }
   0xd   :  { %p443_p7 = pnand %p442_p6, %p436_p3 }
   0xf   :  { %446 = shalt.err (!%p443_p7)
}
  0x10   :  { %s474_s28 = smov 128   ;;  %s475_s29 = smov 8  }
  0x11   :  { %25 = dma.hbm_to_vmem [thread:$0]  %s547_s1, 1024, %s20_s19, [#allocation3], %s474_s28, %s474_s28, %s475_s29  }
  0x12   :  { %s476_s7 = smov [#allocation4]   ;;  %s447_s11 = scalar_lea.hbm %s549_s3, 2048 }
  0x13   :  { %s33_s8 = sshll.u32 %s476_s7, 4  ;;  %p448_p8 = scmp.ne.s32.totalorder %s549_s3, %s447_s11  ;;  %s34_s8 = int_to_ptr.vmem [resolvable:$true] %s33_s8 }
  0x14   :  { %p451_p9 = scmp.lt.u32.totalorder %s447_s11, %s549_s3 }
  0x16   :  { %p453_p10 = pnand %p451_p9, %p448_p8 }
  0x18   :  { %456 = shalt.err (!%p453_p10)
}
  0x19   :  { %s457_s16 = scalar_lea.vmem %s34_s8, 2048  ;;  %p462_p12 = scmp.lt.s32.totalorder %s34_s8, %s34_s8 }
  0x1a   :  { %p458_p11 = scmp.ne.s32.totalorder %s34_s8, %s457_s16  ;;  %p463_p13 = scmp.lt.s32.totalorder %s457_s16, %s457_s16 }
  0x1c   :  { %p464_p0 = por %p463_p13, %p462_p12 }
  0x1e   :  { %p465_p1 = pnand %p464_p0, %p458_p11 }
  0x20   :  { %468 = shalt.err (!%p465_p1)
}
  0x21   :  { %s477_s1 = smov 64   ;;  %s478_s17 = smov 4  }
  0x22   :  { %39 = dma.hbm_to_vmem [thread:$0]  %s549_s3, 2048, %s34_s8, [#allocation5], %s477_s1, %s477_s1, %s478_s17  }
  0x23   :  { %469 = dma.done.wait [#allocation3], 1024  }
  0x24   :  { %470 = vsyncadd [#allocation3], 4294966272 }
  0x25   :  { %471 = dma.done.wait [#allocation5], 2048  }
  0x26   :  { %472 = vsyncadd [#allocation5], 4294965248  ;;  %v479_v0 = vmov 0   ;;  %v397_v1 = vld [vmem:[#allocation2 + $0x4] ss:$8 sps:$4 sm:$0xff]   ;;  %v413_v13 = vld [vmem:[#allocation4 + $0x50] sm:$0xff]   ;;  %v61_v27 = vlaneseq }
  0x27   :  { %147 = vmatprep.mubr.bf16.mxu0 %v479_v0  ;;  %v399_v2 = vld [vmem:[#allocation2] ss:$8 sps:$4 sm:$0xff]   ;;  %115 = vmatprep.subr.bf16.mxu0 %v397_v1  ;;  %v400_v3 = vld [vmem:[#allocation2 + $0x14] ss:$8 sps:$4 sm:$0xff]   ;;  %v402_v4 = vld [vmem:[#allocation2 + $0x10] ss:$8 sps:$4 sm:$0xff]  }
  0x28   :  { %116 = vmatpush1.bf16.msra.mxu0 %v399_v2  ;;  %v403_v5 = vld [vmem:[#allocation2 + $0x24] ss:$8 sps:$4 sm:$0xff]   ;;  %v405_v6 = vld [vmem:[#allocation2 + $0x20] ss:$8 sps:$4 sm:$0xff]   ;;  %v406_v7 = vld [vmem:[#allocation2 + $0x34] ss:$8 sps:$4 sm:$0xff]  }
  0x29   :  { %117 = vmatprep.subr.bf16.mxu0 %v400_v3  ;;  %v409_v8 = vld [vmem:[#allocation4 + $0x40] sm:$0xff]   ;;  %v411_v10 = vld [vmem:[#allocation4 + $0x48] sm:$0xff]   ;;  %v408_v11 = vld [vmem:[#allocation2 + $0x30] ss:$8 sps:$4 sm:$0xff]   ;;  %vm111_vm0 = vcmask 523264   ;;  %v62_v28 = vshrl.u32 %v61_v27, 7 }
  0x2a   :  { %v410_v9 = vld [vmem:[#allocation4] sm:$0xff]   ;;  %368 = vmatprep.subr.bf16.mxu1 %v409_v8  ;;  %v412_v12 = vld [vmem:[#allocation4 + $0x8] sm:$0xff]   ;;  %v414_v15 = vld [vmem:[#allocation4 + $0x10] sm:$0xff]  }
  0x2b   :  { %369 = vmatpush3.bf16.msra.mxu1 %v410_v9  ;;  %v49_v14 = vld [vmem:[%s546_s0] sm:$0x3]  ;;  %v415_v17 = vld [vmem:[#allocation4 + $0x58] sm:$0xff]   ;;  %v419_v21 = vld [vmem:[#allocation4 + $0x68] sm:$0xff]   ;;  %v63_v29 = vsub.s32 0, %v62_v28  ;;  %v67_v31 = vsub.s32 1, %v62_v28 }
  0x2c   :  { %118 = vmatpush1.bf16.msra.mxu0 %v402_v4  ;;  %370 = vmatprep.subr.bf16.mxu1 %v411_v10  ;;  %v50_v16 = vpack.c.bf16 %v49_v14, %v49_v14  ;;  %v416_v18 = vld [vmem:[#allocation4 + $0x18] sm:$0xff]   ;;  %v417_v19 = vld [vmem:[#allocation4 + $0x60] sm:$0xff]   ;;  %v420_v22 = vld [vmem:[#allocation4 + $0x28] sm:$0xff]  }
  0x2d   :  { %119 = vmatprep.subr.bf16.mxu0 %v403_v5  ;;  %v418_v20 = vld [vmem:[#allocation4 + $0x20] sm:$0xff]   ;;  %v421_v23 = vld [vmem:[#allocation4 + $0x70] sm:$0xff]   ;;  %v423_v25 = vld [vmem:[#allocation4 + $0x78] sm:$0xff]  }
  0x2e   :  { %v422_v24 = vld [vmem:[#allocation4 + $0x30] sm:$0xff]   ;;  %v424_v26 = vld [vmem:[#allocation4 + $0x38] sm:$0xff]   ;;  %v59_v30 = vld [vmem:[%s548_s2] sm:$0x3] }
  0x2f   :  { %371 = vmatpush3.bf16.msra.mxu1 %v412_v12  ;;  %v64_v32 = vrot.slane %v59_v30, %v63_v29  ;;  %v68_v33 = vrot.slane %v59_v30, %v67_v31  ;;  %v351_v45 = vld [vmem:[%s550_s4] ss:$0 sm:$0xff] }
  0x30   :  { %120 = vmatpush1.bf16.msra.mxu0 %v405_v6  ;;  %372 = vmatprep.subr.bf16.mxu1 %v413_v13 }
  0x31   :  { %121 = vmatprep.subr.bf16.mxu0 %v406_v7 }
  0x33   :  { %373 = vmatpush3.bf16.msra.mxu1 %v414_v15 }
  0x34   :  { %122 = vmatpush1.bf16.msra.mxu0 %v408_v11  ;;  %374 = vmatprep.subr.bf16.mxu1 %v415_v17 }
  0x37   :  { %350 = vmatmul.mubr.msk.bf16.vlgmr.msra.gmra.mrb[0].mxu0 %vm111_vm0, %v50_v16  ;;  %375 = vmatpush3.bf16.msra.mxu1 %v416_v18 }
  0x38   :  { %376 = vmatprep.subr.bf16.mxu1 %v417_v19 }
  0x3b   :  { %377 = vmatpush3.bf16.msra.mxu1 %v418_v20 }
  0x3c   :  { %378 = vmatprep.subr.bf16.mxu1 %v419_v21 }
  0x3f   :  { %379 = vmatpush3.bf16.msra.mxu1 %v420_v22 }
  0x40   :  { %380 = vmatprep.subr.bf16.mxu1 %v421_v23 }
  0x43   :  { %381 = vmatpush3.bf16.msra.mxu1 %v422_v24 }
  0x44   :  { %382 = vmatprep.subr.bf16.mxu1 %v423_v25 }
  0x47   :  { %383 = vmatpush3.bf16.msra.mxu1 %v424_v26 }
 0x10a   :  { %v149_v34 = vpop.f32.mrb[0].mxu0 }
 0x10b   :  { %v150_v35 = vadd.f32 %v149_v34, %v64_v32  ;;  %v151_v36 = vpop.f32.mrb[1].mxu0 }
 0x10c   :  { %v152_v37 = vadd.f32 %v151_v36, %v68_v33  ;;  %v153_v38 = vpop.f32.mrb[2].mxu0 }
 0x10d   :  { %v156_v39 = vmax.f32 %v150_v35, 0.0  ;;  %v154_v40 = vpop.f32.mrb[3].mxu0 }
 0x10e   :  { %v157_v41 = vmax.f32 %v152_v37, 0.0 }
 0x10f   :  { %v158_v43 = vpack.c.bf16 %v156_v39, %v156_v39 }
 0x110   :  { %v159_v42 = vpack.c.bf16 %v157_v41, %v157_v41 }
 0x112   :  { %327 = vmatprep.mubr.bf16.mxu1 %v159_v42 }
 0x113   :  { %328 = vmatmul.mubr.bf16.vlgmr.msra.gmra.mrb[0].mxu1 %v158_v43 }
 0x1e6   :  { %v384_v44 = vpop.f32.mrb[0].mxu1 }
 0x1e7   :  { %v385_v46 = vpop.f32.mrb[1].mxu1 }
 0x1e8   :  { %v386_v47 = vadd.f32 %v385_v46, %v384_v44  ;;  %v387_v48 = vpop.f32.mrb[2].mxu1 }
 0x1e9   :  { %v388_v49 = vpop.f32.mrb[3].mxu1 }
 0x1ea   :  { %v330_v50 = vadd.f32 %v386_v47, %v351_v45 }
 0x1ec   :  { %335 = vst [vmem:[%s551_s5] sm:$0x3] %v330_v50 }
 0x1ed   :  { %340 = vsyncpa [#allocation3], 1 }
 0x1ee   :  { %341 = vsyncpa [#allocation5], 1 }

</bundles_post_ra>
